<compile_context>
chip_gen: v7x
topology: tpu7x:2x2x1
jax: 0.10.0
libtpu: 0.0.40
codegen_flags: <defaults>
</compile_context>

<pallas_src>
import jax
import jax.numpy as jnp
from jax.experimental import pallas as pl
from jax.experimental.pallas import tpu as pltpu

IN_FEATURES = 28 * 28            # 784
HIDDEN = 8 * 8 * 8               # 512
OUT_FEATURES = 10

K_PAD = 896                      # 7 * 128  (784 padded up to a lane multiple)
N_PAD = 128                      # 10 padded up to one full lane group


def _round_up(x, m):
    return (x + m - 1) // m * m


def fused_mlp_kernel(x_ref, wf_ref, bf_ref, o_ref):
    # One MXU matmul per batch tile: bf16 inputs, f32 accumulation, f32 bias add,
    # lane-dense (tb, 128) output stores.
    acc = jnp.dot(x_ref[...], wf_ref[...], preferred_element_type=jnp.float32)
    o_ref[...] = acc + bf_ref[...]


def fuse_and_pad_params(w1, b1, w2, b2):
    """One-time weight preprocessing (call once, outside the per-batch hot path).

    MNISTModel has no activation between its Linears, so its forward pass is
    exactly the single affine map  x @ (w1 @ w2) + (b1 @ w2 + b2).
    Weights are stored (in_features, out_features), i.e. transposed vs PyTorch.
    """
    wf = jnp.dot(w1, w2, preferred_element_type=jnp.float32)        # (784, 10)
    bf = jnp.dot(b1, w2, preferred_element_type=jnp.float32) + b2   # (10,)

    wf_pad = (jnp.zeros((K_PAD, N_PAD), jnp.float32)
              .at[:IN_FEATURES, :OUT_FEATURES].set(wf))
    bf_pad = jnp.zeros((1, N_PAD), jnp.float32).at[:, :OUT_FEATURES].set(bf)
    # weights in bf16 for half the HBM->VMEM bytes; bias stays f32 (added post-dot)
    return wf_pad.astype(jnp.bfloat16), bf_pad


@jax.jit
def mnist_model_forward(x_nchw, wf_bf16, bf_f32):
    """x_nchw: (B, 1, 28, 28) float32.  Params from fuse_and_pad_params.
    Returns logits (B, 10) float32 — same math as the PyTorch module."""
    B = x_nchw.shape[0]

    # nn.Flatten (row-major, matches PyTorch NCHW flatten) + batch/K zero-padding.
    x2d = x_nchw.reshape(B, IN_FEATURES)
    tb = 256 if B >= 256 else _round_up(B, 8)        # batch tile (multiple of 8)
    b_pad = _round_up(B, tb)
    x_pad = (jnp.zeros((b_pad, K_PAD), jnp.float32)
             .at[:B, :IN_FEATURES].set(x2d)).astype(jnp.bfloat16)

    out = pl.pallas_call(
        fused_mlp_kernel,
        out_shape=jax.ShapeDtypeStruct((b_pad, N_PAD), jnp.float32),
        grid=(b_pad // tb,),
        in_specs=[
            pl.BlockSpec((tb, K_PAD), lambda i: (i, 0)),      # activations: tiled over batch
            pl.BlockSpec((K_PAD, N_PAD), lambda i: (0, 0)),   # fused weights: VMEM-resident
            pl.BlockSpec((1, N_PAD), lambda i: (0, 0)),       # fused bias:   VMEM-resident
        ],
        out_specs=pl.BlockSpec((tb, N_PAD), lambda i: (i, 0)),
        compiler_params=pltpu.CompilerParams(
            dimension_semantics=("parallel",)),               # megacore / v7x 2-TC sharding
    )(x_pad, wf_bf16, bf_f32)

    return out[:B, :OUT_FEATURES]


def init_params(key):
    """PyTorch nn.Linear-style init (uniform +-1/sqrt(fan_in)); weights (in, out)."""
    k1, k2, k3, k4 = jax.random.split(key, 4)
    bound1 = 1.0 / jnp.sqrt(IN_FEATURES)
    bound2 = 1.0 / jnp.sqrt(HIDDEN)
    w1 = jax.random.uniform(k1, (IN_FEATURES, HIDDEN), jnp.float32,
                            minval=-bound1, maxval=bound1)
    b1 = jax.random.uniform(k2, (HIDDEN,), jnp.float32,
                            minval=-bound1, maxval=bound1)
    w2 = jax.random.uniform(k3, (HIDDEN, OUT_FEATURES), jnp.float32,
                            minval=-bound2, maxval=bound2)
    b2 = jax.random.uniform(k4, (OUT_FEATURES,), jnp.float32,
                            minval=-bound2, maxval=bound2)
    return w1, b1, w2, b2


if __name__ == "__main__":
    key = jax.random.PRNGKey(0)
    k_x, k_p = jax.random.split(key)

    B = 8
    x = jax.random.normal(k_x, (B, 1, 28, 28), jnp.float32)   # NCHW like PyTorch
    w1, b1, w2, b2 = init_params(k_p)

    # one-time weight preprocessing (fusion + padding + bf16 cast)
    wf_bf16, bf_f32 = fuse_and_pad_params(w1, b1, w2, b2)

    logits = mnist_model_forward(x, wf_bf16, bf_f32)
    logits = jax.block_until_ready(logits)

    # fidelity check vs. the unfused full-precision two-layer reference
    ref = x.reshape(B, IN_FEATURES) @ w1 + b1
    ref = ref @ w2 + b2
    assert logits.shape == (B, OUT_FEATURES)
    assert jnp.allclose(logits, ref, atol=5e-2, rtol=5e-2), (
        "max abs diff = %f" % float(jnp.max(jnp.abs(logits - ref))))

    print("KERNEL_OK")
</pallas_src>

<mosaic_0001>
module attributes {stable_mosaic.version = 11 : i64} {
  func.func @fused_mlp_kernel(%arg0: i32, %arg1: memref<8x896xbf16, #tpu.memory_space<vmem>>, %arg2: memref<896x128xbf16, #tpu.memory_space<vmem>>, %arg3: memref<1x128xf32, #tpu.memory_space<vmem>>, %arg4: memref<8x128xf32, #tpu.memory_space<vmem>>) attributes {dimension_semantics = [#tpu.dimension_semantics<parallel>], iteration_bounds = array<i64: 1>, scalar_prefetch = 0 : i64, scratch_operands = 0 : i64, tpu.core_type = #tpu.core_type<tc>, window_params = [{transform_indices = @transform_0, window_bounds = array<i64: 8, 896>}, {pipeline_mode = #tpu.pipeline_mode<synchronous>, transform_indices = @transform_1, window_bounds = array<i64: 896, 128>}, {pipeline_mode = #tpu.pipeline_mode<synchronous>, transform_indices = @transform_2, window_bounds = array<i64: 1, 128>}, {transform_indices = @transform_3, window_bounds = array<i64: 8, 128>}]} {
    %c0 = arith.constant 0 : index
    %c0_0 = arith.constant 0 : index
    %0 = vector.load %arg1[%c0, %c0_0] : memref<8x896xbf16, #tpu.memory_space<vmem>>, vector<8x896xbf16>
    %c0_1 = arith.constant 0 : index
    %c0_2 = arith.constant 0 : index
    %1 = vector.load %arg2[%c0_1, %c0_2] : memref<896x128xbf16, #tpu.memory_space<vmem>>, vector<896x128xbf16>
    %cst = arith.constant dense<0.000000e+00> : vector<8x128xf32>
    %2 = tpu.matmul %0, %1, %cst {dimension_numbers = #tpu.dot_dimension_numbers<[1], [0], [0], [1], [0, 0, 1, 1], [], []>} : vector<8x896xbf16>, vector<896x128xbf16>, vector<8x128xf32> -> vector<8x128xf32>
    %c0_3 = arith.constant 0 : index
    %c0_4 = arith.constant 0 : index
    %3 = vector.load %arg3[%c0_3, %c0_4] : memref<1x128xf32, #tpu.memory_space<vmem>>, vector<1x128xf32>
    %4 = vector.broadcast %3 : vector<1x128xf32> to vector<8x128xf32>
    %5 = arith.addf %2, %4 : vector<8x128xf32>
    %c0_5 = arith.constant 0 : index
    %c0_6 = arith.constant 0 : index
    %6 = vector.load %arg4[%c0_5, %c0_6] : memref<8x128xf32, #tpu.memory_space<vmem>>, vector<8x128xf32>
    tpu.vector_store %arg4[%c0_5, %c0_6], %5 {strides = array<i32>} : memref<8x128xf32, #tpu.memory_space<vmem>>, vector<8x128xf32>,
    return
  }
  func.func @transform_0(%arg0: i32) -> (i32, i32) {
    %c0_i32 = arith.constant 0 : i32
    %c0_i32_0 = arith.constant 0 : i32
    return %arg0, %c0_i32 : i32, i32
  }
  func.func @transform_1(%arg0: i32) -> (i32, i32) {
    %c0_i32 = arith.constant 0 : i32
    %c0_i32_0 = arith.constant 0 : i32
    %c0_i32_1 = arith.constant 0 : i32
    return %c0_i32, %c0_i32_0 : i32, i32
  }
  func.func @transform_2(%arg0: i32) -> (i32, i32) {
    %c0_i32 = arith.constant 0 : i32
    %c0_i32_0 = arith.constant 0 : i32
    %c0_i32_1 = arith.constant 0 : i32
    return %c0_i32, %c0_i32_0 : i32, i32
  }
  func.func @transform_3(%arg0: i32) -> (i32, i32) {
    %c0_i32 = arith.constant 0 : i32
    %c0_i32_0 = arith.constant 0 : i32
    return %arg0, %c0_i32 : i32, i32
  }
}

</mosaic_0001>

<bundles_post_ra>
// kernel: mnist_model_forward.1
= control target key start
LH: loop header
LB: loop body
LE: loop exit
PB: predicated region body
PF: predicated region fallthrough
CT: control target
= control target key end

     0   :  { %v924_v42 = vmov 0.0   ;;  %vm925_vm0 = vmmov 0   ;;  %s1142_s0 = inlined_call_operand.vmem [shape: bf16[8,896], index: 0, kind: input, shape index: {}]   ;;  %s1143_s1 = inlined_call_operand.vmem [shape: bf16[896,128], index: 1, kind: input, shape index: {}]   ;;  %s1144_s2 = inlined_call_operand.vmem [shape: f32[1,128], index: 2, kind: input, shape index: {}]   ;;  %s1145_s3 = inlined_call_operand.hbm [shape: f32[8,128], index: 3, kind: output, shape index: {}]  }
   0x1   :  { %v837_v0 = vld [vmem:[%s1143_s1 + $0x40] sm:$0xff]   ;;  %v841_v4 = vld [vmem:[%s1143_s1 + $0x48] sm:$0xff]   ;;  %v845_v8 = vld [vmem:[%s1143_s1 + $0x50] sm:$0xff]  }
   0x2   :  { %v838_v1 = vld [vmem:[%s1143_s1] sm:$0xff]   ;;  %739 = vmatprep.subr.bf16.mxu0 %v837_v0  ;;  %v842_v5 = vld [vmem:[%s1143_s1 + $0x8] sm:$0xff]   ;;  %v846_v9 = vld [vmem:[%s1143_s1 + $0x10] sm:$0xff]  }
   0x3   :  { %v839_v2 = vld [vmem:[%s1143_s1 + $0xc0] sm:$0xff]   ;;  %740 = vmatpush3.bf16.msra.mxu0 %v838_v1  ;;  %v843_v6 = vld [vmem:[%s1143_s1 + $0xc8] sm:$0xff]   ;;  %v847_v10 = vld [vmem:[%s1143_s1 + $0xd0] sm:$0xff]  }
   0x4   :  { %v840_v3 = vld [vmem:[%s1143_s1 + $0x80] sm:$0xff]   ;;  %761 = vmatprep.subr.bf16.mxu1 %v839_v2  ;;  %741 = vmatprep.subr.bf16.mxu0 %v841_v4  ;;  %v844_v7 = vld [vmem:[%s1143_s1 + $0x88] sm:$0xff]   ;;  %v848_v11 = vld [vmem:[%s1143_s1 + $0x90] sm:$0xff]  }
   0x5   :  { %762 = vmatpush3.bf16.msra.mxu1 %v840_v3  ;;  %v849_v12 = vld [vmem:[%s1143_s1 + $0x58] sm:$0xff]   ;;  %v853_v16 = vld [vmem:[%s1143_s1 + $0x60] sm:$0xff]   ;;  %v857_v20 = vld [vmem:[%s1143_s1 + $0x68] sm:$0xff]  }
   0x6   :  { %763 = vmatprep.subr.bf16.mxu1 %v843_v6  ;;  %v850_v13 = vld [vmem:[%s1143_s1 + $0x18] sm:$0xff]   ;;  %v854_v17 = vld [vmem:[%s1143_s1 + $0x20] sm:$0xff]   ;;  %v858_v21 = vld [vmem:[%s1143_s1 + $0x28] sm:$0xff]  }
   0x7   :  { %742 = vmatpush3.bf16.msra.mxu0 %v842_v5  ;;  %v851_v14 = vld [vmem:[%s1143_s1 + $0xd8] sm:$0xff]   ;;  %v855_v18 = vld [vmem:[%s1143_s1 + $0xe0] sm:$0xff]   ;;  %v859_v22 = vld [vmem:[%s1143_s1 + $0xe8] sm:$0xff]  }
   0x8   :  { %743 = vmatprep.subr.bf16.mxu0 %v845_v8  ;;  %v852_v15 = vld [vmem:[%s1143_s1 + $0x98] sm:$0xff]   ;;  %v856_v19 = vld [vmem:[%s1143_s1 + $0xa0] sm:$0xff]   ;;  %v860_v23 = vld [vmem:[%s1143_s1 + $0xa8] sm:$0xff]  }
   0x9   :  { %764 = vmatpush3.bf16.msra.mxu1 %v844_v7  ;;  %v861_v24 = vld [vmem:[%s1143_s1 + $0x70] sm:$0xff]   ;;  %v865_v28 = vld [vmem:[%s1143_s1 + $0x78] sm:$0xff]   ;;  %v16_v31 = vld [vmem:[%s1142_s0] sm:$0xff] }
   0xa   :  { %765 = vmatprep.subr.bf16.mxu1 %v847_v10  ;;  %v862_v25 = vld [vmem:[%s1143_s1 + $0x30] sm:$0xff]   ;;  %v866_v29 = vld [vmem:[%s1143_s1 + $0x38] sm:$0xff]   ;;  %v676_v32 = vcombine.low %v16_v31, %v16_v31  ;;  %v677_v33 = vcombine.high %v16_v31, %v16_v31  ;;  %v871_v35 = vld [vmem:[%s1143_s1 + $0x140] sm:$0xff]  }
   0xb   :  { %744 = vmatpush3.bf16.msra.mxu0 %v846_v9  ;;  %v863_v26 = vld [vmem:[%s1143_s1 + $0xf0] sm:$0xff]   ;;  %v867_v30 = vld [vmem:[%s1143_s1 + $0xf8] sm:$0xff]   ;;  %v17_v36 = vld [vmem:[%s1142_s0 + $0x8] sm:$0xff] }
   0xc   :  { %745 = vmatprep.subr.bf16.mxu0 %v849_v12  ;;  %v864_v27 = vld [vmem:[%s1143_s1 + $0xb0] sm:$0xff]   ;;  %v870_v34 = vld [vmem:[%s1143_s1 + $0xb8] sm:$0xff]   ;;  %532 = vmatprep.mubr.bf16.mxu0 %v677_v33  ;;  %v678_v37 = vcombine.low %v17_v36, %v17_v36  ;;  %v679_v38 = vcombine.high %v17_v36, %v17_v36  ;;  %v874_v39 = vld [vmem:[%s1143_s1 + $0x100] sm:$0xff]  }
   0xd   :  { %766 = vmatpush3.bf16.msra.mxu1 %v848_v11  ;;  %v875_v40 = vld [vmem:[%s1143_s1 + $0x180] sm:$0xff]   ;;  %v876_v41 = vld [vmem:[%s1143_s1 + $0x148] sm:$0xff]   ;;  %v879_v45 = vld [vmem:[%s1143_s1 + $0x150] sm:$0xff]  }
   0xe   :  { %767 = vmatprep.subr.bf16.mxu1 %v851_v14  ;;  %572 = vmatprep.mubr.bf16.mxu1 %v679_v38  ;;  %v877_v43 = vld [vmem:[%s1143_s1 + $0x108] sm:$0xff]   ;;  %v880_v46 = vld [vmem:[%s1143_s1 + $0x110] sm:$0xff]   ;;  %v882_v48 = vld [vmem:[%s1143_s1 + $0x158] sm:$0xff]  }
   0xf   :  { %746 = vmatpush3.bf16.msra.mxu0 %v850_v13  ;;  %v878_v44 = vld [vmem:[%s1143_s1 + $0x188] sm:$0xff]   ;;  %v881_v47 = vld [vmem:[%s1143_s1 + $0x190] sm:$0xff]   ;;  %v883_v49 = vld [vmem:[%s1143_s1 + $0x118] sm:$0xff]  }
  0x10   :  { %747 = vmatprep.subr.bf16.mxu0 %v853_v16  ;;  %v885_v50 = vld [vmem:[%s1143_s1 + $0x160] sm:$0xff]   ;;  %v884_v51 = vld [vmem:[%s1143_s1 + $0x198] sm:$0xff]   ;;  %v888_v53 = vld [vmem:[%s1143_s1 + $0x168] sm:$0xff]  }
  0x11   :  { %768 = vmatpush3.bf16.msra.mxu1 %v852_v15  ;;  %v886_v52 = vld [vmem:[%s1143_s1 + $0x120] sm:$0xff]   ;;  %v889_v55 = vld [vmem:[%s1143_s1 + $0x128] sm:$0xff]   ;;  %v891_v56 = vld [vmem:[%s1143_s1 + $0x170] sm:$0xff]  }
  0x12   :  { %769 = vmatprep.subr.bf16.mxu1 %v855_v18  ;;  %v887_v54 = vld [vmem:[%s1143_s1 + $0x1a0] sm:$0xff]   ;;  %v890_v57 = vld [vmem:[%s1143_s1 + $0x1a8] sm:$0xff]   ;;  %v18_v58 = vld [vmem:[%s1142_s0 + $0x10] sm:$0xff] }
  0x13   :  { %748 = vmatpush3.bf16.msra.mxu0 %v854_v17  ;;  %v892_v59 = vld [vmem:[%s1143_s1 + $0x130] sm:$0xff]   ;;  %v681_v60 = vcombine.high %v18_v58, %v18_v58  ;;  %v894_v61 = vld [vmem:[%s1143_s1 + $0x178] sm:$0xff]  }
  0x14   :  { %749 = vmatprep.subr.bf16.mxu0 %v857_v20 }
  0x15   :  { %770 = vmatpush3.bf16.msra.mxu1 %v856_v19 }
  0x16   :  { %771 = vmatprep.subr.bf16.mxu1 %v859_v22 }
  0x17   :  { %750 = vmatpush3.bf16.msra.mxu0 %v858_v21 }
  0x18   :  { %751 = vmatprep.subr.bf16.mxu0 %v861_v24 }
  0x19   :  { %772 = vmatpush3.bf16.msra.mxu1 %v860_v23 }
  0x1a   :  { %773 = vmatprep.subr.bf16.mxu1 %v863_v26 }
  0x1b   :  { %752 = vmatpush3.bf16.msra.mxu0 %v862_v25 }
  0x1c   :  { %753 = vmatprep.subr.bf16.mxu0 %v865_v28 }
  0x1d   :  { %774 = vmatpush3.bf16.msra.mxu1 %v864_v27 }
  0x1e   :  { %775 = vmatprep.subr.bf16.mxu1 %v867_v30 }
  0x1f   :  { %754 = vmatpush3.bf16.msra.mxu0 %v866_v29 }
  0x20   :  { %783 = vmatprep.subr.bf16.mxu0 %v871_v35 }
  0x21   :  { %776 = vmatpush3.bf16.msra.mxu1 %v870_v34 }
  0x22   :  { %533 = vmatmul.mubr.bf16.vlgmr.msra.gmra.mrb[0].mxu0 %v676_v32  ;;  %814 = vmatprep.subr.bf16.mxu1 %v924_v42 }
  0x23   :  { %784 = vmatpush3.bf16.msra.mxu0 %v874_v39 }
  0x24   :  { %573 = vmatmul.mubr.bf16.vlgmr.msra.gmra.mrb[0].mxu1 %v678_v37  ;;  %785 = vmatprep.subr.bf16.mxu0 %v876_v41 }
  0x25   :  { %815 = vmatpush3.bf16.msra.mxu1 %v875_v40  ;;  %830 = vmatprep.mubr.msk.bf16.mxu1 %vm925_vm0, %v924_v42 }
  0x26   :  { %816 = vmatprep.subr.bf16.mxu1 %v924_v42 }
  0x27   :  { %786 = vmatpush3.bf16.msra.mxu0 %v877_v43 }
  0x28   :  { %787 = vmatprep.subr.bf16.mxu0 %v879_v45 }
  0x29   :  { %817 = vmatpush3.bf16.msra.mxu1 %v878_v44 }
  0x2a   :  { %818 = vmatprep.subr.bf16.mxu1 %v924_v42 }
  0x2b   :  { %788 = vmatpush3.bf16.msra.mxu0 %v880_v46 }
  0x2c   :  { %789 = vmatprep.subr.bf16.mxu0 %v882_v48 }
  0x2d   :  { %819 = vmatpush3.bf16.msra.mxu1 %v881_v47 }
  0x2e   :  { %820 = vmatprep.subr.bf16.mxu1 %v924_v42 }
  0x2f   :  { %790 = vmatpush3.bf16.msra.mxu0 %v883_v49 }
  0x30   :  { %791 = vmatprep.subr.bf16.mxu0 %v885_v50 }
  0x31   :  { %821 = vmatpush3.bf16.msra.mxu1 %v884_v51 }
  0x32   :  { %822 = vmatprep.subr.bf16.mxu1 %v924_v42 }
  0x33   :  { %792 = vmatpush3.bf16.msra.mxu0 %v886_v52 }
  0x34   :  { %793 = vmatprep.subr.bf16.mxu0 %v888_v53 }
  0x35   :  { %823 = vmatpush3.bf16.msra.mxu1 %v887_v54 }
  0x36   :  { %824 = vmatprep.subr.bf16.mxu1 %v924_v42 }
  0x37   :  { %794 = vmatpush3.bf16.msra.mxu0 %v889_v55 }
  0x38   :  { %795 = vmatprep.subr.bf16.mxu0 %v891_v56 }
  0x39   :  { %8 = vsyncpa [#allocation3], 0  ;;  %825 = vmatpush3.bf16.msra.mxu1 %v890_v57  ;;  %v893_v62 = vld [vmem:[%s1143_s1 + $0x1b0] sm:$0xff]   ;;  %612 = vmatprep.mubr.bf16.mxu0 %v681_v60  ;;  %v895_v63 = vld [vmem:[%s1143_s1 + $0x138] sm:$0xff]   ;;  %v680_v1 = vcombine.low %v18_v58, %v18_v58 }
  0x3a   :  { %826 = vmatprep.subr.bf16.mxu1 %v924_v42  ;;  %v898_v0 = vld [vmem:[%s1143_s1 + $0x1b8] sm:$0xff]   ;;  %v675_v4 = vld [vmem:[%s1144_s2] ss:$0 sm:$0xff] }
  0x3b   :  { %796 = vmatpush3.bf16.msra.mxu0 %v892_v59  ;;  %v899_v2 = vld [vmem:[%s1142_s0 + $0x18] ss:$0 sps:$4 sm:$0xff]   ;;  %s926_s0 = smov [#allocation2]  }
  0x3c   :  { %797 = vmatprep.subr.bf16.mxu0 %v894_v61  ;;  %s667_s1 = sshll.u32 %s926_s0, 4  ;;  %s668_s1 = int_to_ptr.vmem [resolvable:$true] %s667_s1 }
  0x3d   :  { %827 = vmatpush3.bf16.msra.mxu1 %v893_v62  ;;  %s900_s2 = scalar_lea.vmem %s668_s1, 128  ;;  %p905_p1 = scmp.lt.s32.totalorder %s668_s1, %s668_s1 }
  0x3e   :  { %828 = vmatprep.subr.bf16.mxu1 %v924_v42  ;;  %p901_p0 = scmp.ne.s32.totalorder %s668_s1, %s900_s2  ;;  %p906_p2 = scmp.lt.s32.totalorder %s900_s2, %s900_s2 }
  0x3f   :  { %798 = vmatpush3.bf16.msra.mxu0 %v895_v63 }
  0x40   :  { %p907_p3 = por %p906_p2, %p905_p1 }
  0x41   :  { %829 = vmatpush3.bf16.msra.mxu1 %v898_v0 }
  0x42   :  { %613 = vmatmul.mubr.bf16.vlgmr.msra.gmra.mrb[4].mxu0 %v680_v1  ;;  %p908_p4 = pnand %p907_p3, %p901_p0 }
  0x44   :  { %831 = vmatmul.mubr.bf16.vlgmr.msra.gmra.mrb[4].mxu1 %v899_v2 }
  0xf5   :  { %v755_v3 = vpop.f32.mrb[0].mxu0 }
  0xf6   :  { %v756_v5 = vpop.f32.mrb[1].mxu0 }
  0xf7   :  { %v757_v6 = vadd.f32 %v756_v5, %v755_v3  ;;  %v758_v7 = vpop.f32.mrb[2].mxu0  ;;  %v777_v8 = vpop.f32.mrb[0].mxu1 }
  0xf8   :  { %v759_v9 = vpop.f32.mrb[3].mxu0  ;;  %v778_v10 = vpop.f32.mrb[1].mxu1 }
  0xf9   :  { %v535_v11 = vadd.f32 %v757_v6, %v675_v4  ;;  %v779_v12 = vadd.f32 %v778_v10, %v777_v8  ;;  %v780_v13 = vpop.f32.mrb[2].mxu1 }
  0xfa   :  { %v781_v14 = vpop.f32.mrb[3].mxu1 }
  0xfb   :  { %v575_v15 = vadd.f32 %v779_v12, %v535_v11 }
 0x115   :  { %v799_v16 = vpop.f32.mrb[4].mxu0 }
 0x116   :  { %v800_v17 = vpop.f32.mrb[5].mxu0 }
 0x117   :  { %v801_v18 = vadd.f32 %v800_v17, %v799_v16  ;;  %v802_v19 = vpop.f32.mrb[6].mxu0  ;;  %v654_v20 = vpop.f32.mrb[4].mxu1 }
 0x118   :  { %v803_v21 = vpop.f32.mrb[7].mxu0  ;;  %v832_v22 = vpop.f32.mrb[5].mxu1 }
 0x119   :  { %v615_v23 = vadd.f32 %v801_v18, %v575_v15  ;;  %v657_v24 = vpop.f32.mrb[6].mxu1 }
 0x11a   :  { %v833_v25 = vpop.f32.mrb[7].mxu1 }
 0x11b   :  { %v655_v26 = vadd.f32 %v654_v20, %v615_v23 }
 0x11d   :  { %660 = vst [vmem:[#allocation2] sm:$0xff] %v655_v26 }
 0x11e   :  { %911 = shalt.err (!%p908_p4)
}
 0x11f   :  { %s912_s28 = scalar_lea.hbm %s1145_s3, 128 }
 0x120   :  { %p913_p5 = scmp.ne.s32.totalorder %s1145_s3, %s912_s28  ;;  %p916_p6 = scmp.lt.u32.totalorder %s912_s28, %s1145_s3 }
 0x122   :  { %p918_p7 = pnand %p916_p6, %p913_p5 }
 0x124   :  { %921 = shalt.err (!%p918_p7)
}
 0x125   :  { %670 = dma.vmem_to_hbm [thread:$0]  %s668_s1, 128, %s1145_s3, [#allocation3]  }
 0x126   :  { %922 = dma.done.wait [#allocation3], 128  }
 0x127   :  { %923 = vsyncadd [#allocation3], 4294967168 }
 0x128   :  { %674 = vsyncpa [#allocation3], 1 }

</bundles_post_ra>
